<compile_context>
chip_gen: v7x
topology: tpu7x:2x2x1
jax: 0.10.0
libtpu: 0.0.40
codegen_flags: <defaults>
</compile_context>

<pallas_src>
import math

import jax
import jax.numpy as jnp
from jax.experimental import pallas as pl
from jax.experimental.pallas import tpu as pltpu


# ---------------------------------------------------------------------------
# Helpers
# ---------------------------------------------------------------------------

def _cdiv(a: int, b: int) -> int:
    return -(-a // b)


def _round_up(a: int, m: int) -> int:
    return _cdiv(a, m) * m


def _choose_tile(dim: int, preferred: int, align: int):
    """Pick a tile size for `dim`.

    Returns (tile, padded_dim). Either the full dim (if small), a divisor of
    dim that is a multiple of `align` and not too small, or — failing that —
    a near-even split with modest zero padding (never the full huge dim, never
    a degenerate 8/128 tile).
    """
    if dim <= preferred:
        return dim, dim
    pref = max(align, (preferred // align) * align)
    t = pref
    floor = max(align, pref // 4)
    while t >= floor:
        if dim % t == 0:
            return t, dim
        t -= align
    # Near-even split with padding (overhead < n_tiles * align elements).
    n = _cdiv(dim, pref)
    t = _round_up(_cdiv(dim, n), align)
    return t, t * n


_DEFAULT_RESIDENT_WEIGHT_BYTES = 8 * 1024 * 1024   # keep W in VMEM below this
_VMEM_LIMIT_FLOOR = 32 * 1024 * 1024               # lift v5e's 16 MiB default
_VMEM_LIMIT_CAP = 48 * 1024 * 1024                 # headroom on v7x (64 MiB)


def _vmem_limit(need_bytes: int) -> int:
    return int(min(_VMEM_LIMIT_CAP, max(_VMEM_LIMIT_FLOOR, need_bytes * 5 // 4)))


# ---------------------------------------------------------------------------
# Kernels
# ---------------------------------------------------------------------------

def _add_kernel(x_ref, y_ref, o_ref):
    # Elementwise residual add (same_dim path), HBM bound.
    o_ref[...] = (x_ref[...] + y_ref[...]).astype(o_ref.dtype)


def _make_proj_resident_kernel(compute_dtype):
    """Weight fully resident in VMEM: out = dot(x, W_t) + y in one shot."""
    def kernel(x_ref, w_ref, y_ref, o_ref):
        x = x_ref[...].astype(compute_dtype)          # in-kernel cast (free vs MXU)
        acc = jnp.dot(x, w_ref[...], preferred_element_type=jnp.float32)
        o_ref[...] = (acc + y_ref[...].astype(jnp.float32)).astype(o_ref.dtype)
    return kernel


def _make_proj_tiled_kernel(compute_dtype):
    """General (M, N, K) grid with f32 VMEM accumulator; K is the last axis."""
    def kernel(x_ref, w_ref, y_ref, o_ref, acc_ref):
        k = pl.program_id(2)

        @pl.when(k == 0)
        def _():
            # Initialize the accumulator with the residual: removes the +y in
            # the epilogue and one extra full-tile VPU pass.
            acc_ref[...] = y_ref[...].astype(jnp.float32)

        acc_ref[...] += jnp.dot(
            x_ref[...].astype(compute_dtype), w_ref[...],
            preferred_element_type=jnp.float32)

        @pl.when(k == pl.num_programs(2) - 1)
        def _():
            o_ref[...] = acc_ref[...].astype(o_ref.dtype)
    return kernel


# ---------------------------------------------------------------------------
# Wrappers (pallas_call glue)
# ---------------------------------------------------------------------------

def _skip_add(x, y):
    """out = x + y, elementwise, identical shapes."""
    assert x.shape == y.shape, (x.shape, y.shape)
    out_dtype = jnp.promote_types(x.dtype, y.dtype)
    orig_shape = y.shape
    total = int(y.size)

    # Lane-dense 2-D view: wide (multiple-of-128) last dim -> unmasked vst.
    rows, width = None, None
    for w in (4096, 2048, 1024, 512, 256, 128):
        if total % w == 0:
            rows, width = total // w, w
            break
    if rows is None:
        width = orig_shape[-1]
        rows = max(1, total // width)

    x2d = x.reshape(rows, width)
    y2d = y.reshape(rows, width)

    itemsize = max(x.dtype.itemsize, y.dtype.itemsize)
    # ~4 MiB per input tile: amortizes the ~0.35us/step overhead even at
    # v7x's ~3.2 TB/s HBM bandwidth; 3 arrays x 2 buffers x 4 MiB = 24 MiB.
    preferred_rows = max(8, (((4 * 1024 * 1024) // (width * itemsize)) // 8) * 8)
    tm, rows_pad = _choose_tile(rows, preferred_rows, 8)
    if rows_pad != rows:
        x2d = jnp.pad(x2d, ((0, rows_pad - rows), (0, 0)))
        y2d = jnp.pad(y2d, ((0, rows_pad - rows), (0, 0)))

    vmem_need = 2 * tm * width * (x2d.dtype.itemsize + y2d.dtype.itemsize
                                  + jnp.dtype(out_dtype).itemsize)

    out = pl.pallas_call(
        _add_kernel,
        out_shape=jax.ShapeDtypeStruct((rows_pad, width), out_dtype),
        grid=(rows_pad // tm,),
        in_specs=[
            pl.BlockSpec((tm, width), lambda i: (i, 0)),
            pl.BlockSpec((tm, width), lambda i: (i, 0)),
        ],
        out_specs=pl.BlockSpec((tm, width), lambda i: (i, 0)),
        compiler_params=pltpu.CompilerParams(
            dimension_semantics=("parallel",),
            vmem_limit_bytes=_vmem_limit(vmem_need),
        ),
        cost_estimate=pl.CostEstimate(
            flops=total, transcendentals=0,
            bytes_accessed=3 * total * itemsize),
    )(x2d, y2d)
    if rows_pad != rows:
        out = out[:rows]
    return out.reshape(orig_shape)


def _skip_proj_add(x2d, w_t, y2d, *, compute_dtype,
                   max_resident_weight_bytes=_DEFAULT_RESIDENT_WEIGHT_BYTES,
                   tile_prefs=None):
    """out = x2d @ w_t + y2d  (x2d: [M, Din], w_t: [Din, Dout], y2d: [M, Dout])."""
    M, Din = x2d.shape
    Dout = y2d.shape[1]
    out_dtype = y2d.dtype
    w_bytes = int(w_t.size) * w_t.dtype.itemsize

    # ---------------- resident-weight fast path ----------------
    if w_bytes <= max_resident_weight_bytes:
        # Keep >=2 parallel M steps when possible (v7x has 2 TensorCores).
        if M >= 1024:
            tm_pref = 512
        elif M >= 512:
            tm_pref = 256
        elif M >= 256:
            tm_pref = 128
        else:
            tm_pref = M
        tm, m_pad = _choose_tile(M, tm_pref, 8)
        if m_pad != M:
            x2d = jnp.pad(x2d, ((0, m_pad - M), (0, 0)))
            y2d = jnp.pad(y2d, ((0, m_pad - M), (0, 0)))

        vmem_need = 2 * (w_bytes
                         + tm * Din * x2d.dtype.itemsize
                         + tm * Dout * y2d.dtype.itemsize
                         + tm * Dout * jnp.dtype(out_dtype).itemsize)

        out = pl.pallas_call(
            _make_proj_resident_kernel(compute_dtype),
            out_shape=jax.ShapeDtypeStruct((m_pad, Dout), out_dtype),
            grid=(m_pad // tm,),
            in_specs=[
                pl.BlockSpec((tm, Din), lambda i: (i, 0)),
                pl.BlockSpec((Din, Dout), lambda i: (0, 0)),   # fetched once, resident
                pl.BlockSpec((tm, Dout), lambda i: (i, 0)),
            ],
            out_specs=pl.BlockSpec((tm, Dout), lambda i: (i, 0)),
            compiler_params=pltpu.CompilerParams(
                dimension_semantics=("parallel",),
                vmem_limit_bytes=_vmem_limit(vmem_need),
            ),
            cost_estimate=pl.CostEstimate(
                flops=2 * m_pad * Din * Dout + m_pad * Dout,
                transcendentals=0,
                bytes_accessed=(x2d.size * x2d.dtype.itemsize + w_bytes
                                + 2 * y2d.size * y2d.dtype.itemsize)),
        )(x2d, w_t, y2d)
        if m_pad != M:
            out = out[:M]
        return out

    # ---------------- general tiled path (large weight) ----------------
    tm_pref, tn_pref, tk_pref = tile_prefs if tile_prefs is not None else (512, 512, 1024)
    tm, m_pad = _choose_tile(M, tm_pref, 8)
    tn, n_pad = _choose_tile(Dout, tn_pref, 128)
    tk, k_pad = _choose_tile(Din, tk_pref, 128)

    if (m_pad, k_pad) != (M, Din):
        x2d = jnp.pad(x2d, ((0, m_pad - M), (0, k_pad - Din)))
    if (k_pad, n_pad) != (Din, Dout):
        w_t = jnp.pad(w_t, ((0, k_pad - Din), (0, n_pad - Dout)))
    if (m_pad, n_pad) != (M, Dout):
        y2d = jnp.pad(y2d, ((0, m_pad - M), (0, n_pad - Dout)))

    grid = (m_pad // tm, n_pad // tn, k_pad // tk)

    vmem_need = (2 * (tm * tk * x2d.dtype.itemsize
                      + tk * tn * w_t.dtype.itemsize
                      + tm * tn * y2d.dtype.itemsize
                      + tm * tn * jnp.dtype(out_dtype).itemsize)
                 + tm * tn * 4)

    out = pl.pallas_call(
        _make_proj_tiled_kernel(compute_dtype),
        out_shape=jax.ShapeDtypeStruct((m_pad, n_pad), out_dtype),
        grid_spec=pltpu.PrefetchScalarGridSpec(
            num_scalar_prefetch=0,
            grid=grid,
            in_specs=[
                pl.BlockSpec((tm, tk), lambda i, j, k: (i, k)),
                pl.BlockSpec((tk, tn), lambda i, j, k: (k, j)),
                pl.BlockSpec((tm, tn), lambda i, j, k: (i, j)),
            ],
            out_specs=pl.BlockSpec((tm, tn), lambda i, j, k: (i, j)),
            scratch_shapes=[pltpu.VMEM((tm, tn), jnp.float32)],
        ),
        compiler_params=pltpu.CompilerParams(
            dimension_semantics=("parallel", "parallel", "arbitrary"),
            vmem_limit_bytes=_vmem_limit(vmem_need),
        ),
        cost_estimate=pl.CostEstimate(
            flops=2 * m_pad * k_pad * n_pad,
            transcendentals=0,
            bytes_accessed=(x2d.size * x2d.dtype.itemsize
                            + w_t.size * w_t.dtype.itemsize
                            + 2 * y2d.size * y2d.dtype.itemsize)),
    )(x2d, w_t, y2d)
    if (m_pad, n_pad) != (M, Dout):
        out = out[:M, :Dout]
    return out


# ---------------------------------------------------------------------------
# Module
# ---------------------------------------------------------------------------

class SkipConnection:
    """JAX/Pallas port of the PyTorch SkipConnection module (forward only)."""

    def __init__(self, *, in_dim: int, out_dim: int, key=None,
                 compute_dtype=jnp.bfloat16,
                 max_resident_weight_bytes=_DEFAULT_RESIDENT_WEIGHT_BYTES,
                 tile_prefs=None):
        self.in_dim = in_dim
        self.out_dim = out_dim
        self.same_dim = in_dim == out_dim
        # bf16 operands + f32 MXU accumulation by default (MXU is bf16-native
        # on v5e/v6e/v7x). Pass jnp.float32 for strict nn.Linear f32 numerics.
        self.compute_dtype = compute_dtype
        self.max_resident_weight_bytes = max_resident_weight_bytes
        self.tile_prefs = tile_prefs
        if key is None:
            key = jax.random.PRNGKey(42)
        # nn.Linear default init: U(-1/sqrt(in_dim), 1/sqrt(in_dim)),
        # weight shape (out_dim, in_dim).
        bound = 1.0 / math.sqrt(in_dim)
        self.weight = jax.random.uniform(
            key, (out_dim, in_dim), dtype=jnp.float32, minval=-bound, maxval=bound)
        # Pre-transpose + pre-cast once (constant weight); x is cast per-tile
        # inside the kernel to avoid an extra HBM pass over the activation.
        self.w_t = jnp.transpose(self.weight).astype(compute_dtype)

    def __call__(self, *, block_input, block_output):
        if self.same_dim:
            return _skip_add(block_input, block_output)
        lead_shape = block_output.shape[:-1]
        x2d = block_input.reshape(-1, self.in_dim)
        y2d = block_output.reshape(-1, self.out_dim)
        out = _skip_proj_add(
            x2d, self.w_t, y2d,
            compute_dtype=self.compute_dtype,
            max_resident_weight_bytes=self.max_resident_weight_bytes,
            tile_prefs=self.tile_prefs)
        return out.reshape(*lead_shape, self.out_dim)


# ---------------------------------------------------------------------------
# Demo / correctness check
# ---------------------------------------------------------------------------

def _proj_ref(x, skip, y):
    """Reference matching the kernel's numerics: bf16-rounded operands, f32 acc."""
    xc = x.astype(skip.compute_dtype).astype(jnp.float32)
    wc = skip.w_t.astype(jnp.float32)
    proj = jnp.dot(xc.reshape(-1, xc.shape[-1]), wc,
                   precision=jax.lax.Precision.HIGHEST)
    return proj.reshape(*y.shape[:-1], -1) + y


if __name__ == "__main__":
    key = jax.random.PRNGKey(0)
    ks = jax.random.split(key, 10)

    # --- case 1: different-dim, small shapes (resident weight, single tile) ---
    batch, seq, in_dim, out_dim = 2, 8, 32, 64
    x1 = jax.random.normal(ks[0], (batch, seq, in_dim), dtype=jnp.float32)
    y1 = jax.random.normal(ks[1], (batch, seq, out_dim), dtype=jnp.float32)
    skip1 = SkipConnection(in_dim=in_dim, out_dim=out_dim, key=ks[2])
    out1 = jax.block_until_ready(skip1(block_input=x1, block_output=y1))
    assert out1.shape == (batch, seq, out_dim)
    assert jnp.allclose(out1, _proj_ref(x1, skip1, y1), atol=2e-3, rtol=2e-3)

    # --- case 2: different-dim, resident weight, multiple M tiles ---
    b2, s2, din2, dout2 = 2, 300, 384, 512      # M=600 -> 3 row tiles of 200
    x2 = jax.random.normal(ks[3], (b2, s2, din2), dtype=jnp.float32)
    y2 = jax.random.normal(ks[4], (b2, s2, dout2), dtype=jnp.float32)
    skip2 = SkipConnection(in_dim=din2, out_dim=dout2, key=ks[5])
    out2 = jax.block_until_ready(skip2(block_input=x2, block_output=y2))
    assert out2.shape == (b2, s2, dout2)
    assert jnp.allclose(out2, _proj_ref(x2, skip2, y2), atol=2e-3, rtol=2e-3)

    # --- case 3: force the general (M,N,K)-tiled accumulator path ---
    b3, s3, din3, dout3 = 2, 128, 384, 256      # grid (2, 2, 3) with 128^3 tiles
    x3 = jax.random.normal(ks[6], (b3, s3, din3), dtype=jnp.float32)
    y3 = jax.random.normal(ks[7], (b3, s3, dout3), dtype=jnp.float32)
    skip3 = SkipConnection(in_dim=din3, out_dim=dout3, key=ks[5],
                           max_resident_weight_bytes=0,
                           tile_prefs=(128, 128, 128))
    out3 = jax.block_until_ready(skip3(block_input=x3, block_output=y3))
    assert out3.shape == (b3, s3, dout3)
    assert jnp.allclose(out3, _proj_ref(x3, skip3, y3), atol=2e-3, rtol=2e-3)

    # --- case 4: same-dim path (pure residual add kernel) ---
    # TODO(synk): in a full model, let XLA fuse this add into the producer op
    # instead of a standalone pallas_call (avoids two extra HBM passes).
    x4 = jax.random.normal(ks[8], (batch, seq, out_dim), dtype=jnp.float32)
    y4 = jax.random.normal(ks[9], (batch, seq, out_dim), dtype=jnp.float32)
    skip4 = SkipConnection(in_dim=out_dim, out_dim=out_dim, key=ks[2])
    out4 = jax.block_until_ready(skip4(block_input=x4, block_output=y4))
    assert jnp.allclose(out4, x4 + y4, atol=1e-6)

    print("KERNEL_OK")
</pallas_src>

<mosaic_0001>
module attributes {stable_mosaic.version = 11 : i64} {
  func.func @kernel(%arg0: i32, %arg1: memref<16x32xf32, #tpu.memory_space<vmem>>, %arg2: memref<32x64xbf16, #tpu.memory_space<vmem>>, %arg3: memref<16x64xf32, #tpu.memory_space<vmem>>, %arg4: memref<16x64xf32, #tpu.memory_space<vmem>>) attributes {dimension_semantics = [#tpu.dimension_semantics<parallel>], iteration_bounds = array<i64: 1>, scalar_prefetch = 0 : i64, scratch_operands = 0 : i64, tpu.core_type = #tpu.core_type<tc>, window_params = [{transform_indices = @transform_0, window_bounds = array<i64: 16, 32>}, {pipeline_mode = #tpu.pipeline_mode<synchronous>, transform_indices = @transform_1, window_bounds = array<i64: 32, 64>}, {transform_indices = @transform_2, window_bounds = array<i64: 16, 64>}, {transform_indices = @transform_3, window_bounds = array<i64: 16, 64>}]} {
    %c0 = arith.constant 0 : index
    %c0_0 = arith.constant 0 : index
    %0 = vector.load %arg1[%c0, %c0_0] : memref<16x32xf32, #tpu.memory_space<vmem>>, vector<16x32xf32>
    %1 = arith.truncf %0 : vector<16x32xf32> to vector<16x32xbf16>
    %c0_1 = arith.constant 0 : index
    %c0_2 = arith.constant 0 : index
    %2 = vector.load %arg2[%c0_1, %c0_2] : memref<32x64xbf16, #tpu.memory_space<vmem>>, vector<32x64xbf16>
    %cst = arith.constant dense<0.000000e+00> : vector<16x64xf32>
    %3 = tpu.matmul %1, %2, %cst {dimension_numbers = #tpu.dot_dimension_numbers<[1], [0], [0], [1], [0, 0, 1, 1], [], []>} : vector<16x32xbf16>, vector<32x64xbf16>, vector<16x64xf32> -> vector<16x64xf32>
    %c0_3 = arith.constant 0 : index
    %c0_4 = arith.constant 0 : index
    %4 = vector.load %arg3[%c0_3, %c0_4] : memref<16x64xf32, #tpu.memory_space<vmem>>, vector<16x64xf32>
    %5 = arith.addf %3, %4 : vector<16x64xf32>
    %c0_5 = arith.constant 0 : index
    %c0_6 = arith.constant 0 : index
    %6 = vector.load %arg4[%c0_5, %c0_6] : memref<16x64xf32, #tpu.memory_space<vmem>>, vector<16x64xf32>
    tpu.vector_store %arg4[%c0_5, %c0_6], %5 {strides = array<i32>} : memref<16x64xf32, #tpu.memory_space<vmem>>, vector<16x64xf32>,
    return
  }
  func.func @transform_0(%arg0: i32) -> (i32, i32) {
    %c0_i32 = arith.constant 0 : i32
    %c0_i32_0 = arith.constant 0 : i32
    return %arg0, %c0_i32 : i32, i32
  }
  func.func @transform_1(%arg0: i32) -> (i32, i32) {
    %c0_i32 = arith.constant 0 : i32
    %c0_i32_0 = arith.constant 0 : i32
    %c0_i32_1 = arith.constant 0 : i32
    return %c0_i32, %c0_i32_0 : i32, i32
  }
  func.func @transform_2(%arg0: i32) -> (i32, i32) {
    %c0_i32 = arith.constant 0 : i32
    %c0_i32_0 = arith.constant 0 : i32
    return %arg0, %c0_i32 : i32, i32
  }
  func.func @transform_3(%arg0: i32) -> (i32, i32) {
    %c0_i32 = arith.constant 0 : i32
    %c0_i32_0 = arith.constant 0 : i32
    return %arg0, %c0_i32 : i32, i32
  }
}

</mosaic_0001>

<bundles_post_ra>
// kernel: tpu_custom_call.1
= control target key start
LH: loop header
LB: loop body
LE: loop exit
PB: predicated region body
PF: predicated region fallthrough
CT: control target
= control target key end

     0   :  { %8 = vsyncpa [#allocation3], 0  ;;  %s351_s0 = inlined_call_operand.hbm [shape: f32[16,32], index: 0, kind: input, shape index: {}]   ;;  %s352_s1 = inlined_call_operand.hbm [shape: bf16[32,64], index: 1, kind: input, shape index: {}]   ;;  %s353_s2 = inlined_call_operand.hbm [shape: f32[16,64], index: 2, kind: input, shape index: {}]   ;;  %s354_s3 = inlined_call_operand.hbm [shape: f32[16,64], index: 3, kind: output, shape index: {}]  }
   0x1   :  { %9 = vsyncpa [#allocation6], 0 }
   0x2   :  { %10 = vsyncpa [#allocation4], 0  ;;  %s264_s12 = smov [#allocation5]   ;;  %s170_s16 = scalar_lea.hbm %s352_s1, 256 }
   0x3   :  { %s28_s13 = sshll.u32 %s264_s12, 4  ;;  %p171_p0 = scmp.ne.s32.totalorder %s352_s1, %s170_s16  ;;  %s29_s13 = int_to_ptr.vmem [resolvable:$true] %s28_s13 }
   0x4   :  { %p174_p1 = scmp.lt.u32.totalorder %s170_s16, %s352_s1 }
   0x6   :  { %p176_p2 = pnand %p174_p1, %p171_p0 }
   0x8   :  { %179 = shalt.err (!%p176_p2)
}
   0x9   :  { %s180_s21 = scalar_lea.vmem %s29_s13, 256  ;;  %p185_p4 = scmp.lt.s32.totalorder %s29_s13, %s29_s13 }
   0xa   :  { %p181_p3 = scmp.ne.s32.totalorder %s29_s13, %s180_s21  ;;  %p186_p5 = scmp.lt.s32.totalorder %s180_s21, %s180_s21 }
   0xc   :  { %p187_p6 = por %p186_p5, %p185_p4 }
   0xe   :  { %p188_p7 = pnand %p187_p6, %p181_p3 }
  0x10   :  { %191 = shalt.err (!%p188_p7)
}
  0x11   :  { %s265_s22 = smov 64   ;;  %s266_s23 = smov 4  }
  0x12   :  { %34 = dma.hbm_to_vmem [thread:$0]  %s352_s1, 256, %s29_s13, [#allocation6], %s265_s22, %s265_s22, %s266_s23  }
  0x13   :  { %s267_s26 = smov [#allocation2]   ;;  %s192_s30 = scalar_lea.hbm %s351_s0, 256 }
  0x14   :  { %s16_s27 = sshll.u32 %s267_s26, 4  ;;  %p193_p8 = scmp.ne.s32.totalorder %s351_s0, %s192_s30  ;;  %s17_s27 = int_to_ptr.vmem [resolvable:$true] %s16_s27 }
  0x15   :  { %p196_p9 = scmp.lt.u32.totalorder %s192_s30, %s351_s0 }
  0x17   :  { %p198_p10 = pnand %p196_p9, %p193_p8 }
  0x19   :  { %201 = shalt.err (!%p198_p10)
}
  0x1a   :  { %s202_s8 = scalar_lea.vmem %s17_s27, 256  ;;  %p207_p12 = scmp.lt.s32.totalorder %s17_s27, %s17_s27 }
  0x1b   :  { %p203_p11 = scmp.ne.s32.totalorder %s17_s27, %s202_s8  ;;  %p208_p13 = scmp.lt.s32.totalorder %s202_s8, %s202_s8 }
  0x1d   :  { %p209_p0 = por %p208_p13, %p207_p12 }
  0x1f   :  { %p210_p1 = pnand %p209_p0, %p203_p11 }
  0x21   :  { %213 = shalt.err (!%p210_p1)
}
  0x22   :  { %s268_s1 = smov 128   ;;  %s269_s9 = smov 8  }
  0x23   :  { %22 = dma.hbm_to_vmem [thread:$0]  %s351_s0, 256, %s17_s27, [#allocation3], %s268_s1, %s268_s1, %s269_s9  }
  0x24   :  { %s270_s12 = smov [#allocation7]   ;;  %s214_s16 = scalar_lea.hbm %s353_s2, 256 }
  0x25   :  { %s40_s13 = sshll.u32 %s270_s12, 4  ;;  %p215_p2 = scmp.ne.s32.totalorder %s353_s2, %s214_s16  ;;  %s41_s13 = int_to_ptr.vmem [resolvable:$true] %s40_s13 }
  0x26   :  { %p218_p3 = scmp.lt.u32.totalorder %s214_s16, %s353_s2 }
  0x28   :  { %p220_p4 = pnand %p218_p3, %p215_p2 }
  0x2a   :  { %223 = shalt.err (!%p220_p4)
}
  0x2b   :  { %s224_s21 = scalar_lea.vmem %s41_s13, 256  ;;  %p229_p6 = scmp.lt.s32.totalorder %s41_s13, %s41_s13 }
  0x2c   :  { %p225_p5 = scmp.ne.s32.totalorder %s41_s13, %s224_s21  ;;  %p230_p7 = scmp.lt.s32.totalorder %s224_s21, %s224_s21 }
  0x2e   :  { %p231_p8 = por %p230_p7, %p229_p6 }
  0x30   :  { %p232_p9 = pnand %p231_p8, %p225_p5 }
  0x32   :  { %235 = shalt.err (!%p232_p9)
}
  0x33   :  { %46 = dma.hbm_to_vmem [thread:$0]  %s353_s2, 256, %s41_s13, [#allocation6], %s268_s1, %s268_s1, %s269_s9  }
  0x34   :  { %258 = dma.done.wait [#allocation3], 256  }
  0x35   :  { %259 = vsyncadd [#allocation3], 4294967040 }
  0x36   :  { %260 = dma.done.wait [#allocation6], 512  }
  0x37   :  { %261 = vsyncadd [#allocation6], 4294966784  ;;  %v271_v0 = vmov 0.0   ;;  %vm272_vm0 = vmmov 0   ;;  %v168_v1 = vld [vmem:[#allocation5] sm:$0xff]   ;;  %v169_v2 = vld [vmem:[#allocation5 + $0x8] sm:$0xff]  }
  0x38   :  { %150 = vmatprep.subr.bf16.mxu0 %v271_v0  ;;  %154 = vmatprep.mubr.msk.bf16.mxu0 %vm272_vm0, %v271_v0  ;;  %v57_v3 = vld [vmem:[#allocation2] sm:$0xff]  ;;  %v58_v4 = vld [vmem:[#allocation2 + $0x8] sm:$0xff]  ;;  %vm78_vm1 = vcmask 261120   ;;  %vm123_vm2 = vcmask 523264   ;;  %s273_s2 = smov [#allocation8]  }
  0x39   :  { %151 = vmatpush3.bf16.msra.mxu0 %v168_v1  ;;  %v59_v5 = vpack.c.bf16 %v58_v4, %v57_v3  ;;  %v64_v6 = vld [vmem:[#allocation7] sm:$0xff]  ;;  %v65_v8 = vld [vmem:[#allocation7 + $0x8] sm:$0xff]  ;;  %s131_s23 = sshll.u32 %s273_s2, 4  ;;  %s132_s23 = int_to_ptr.vmem [resolvable:$true] %s131_s23 }
  0x3a   :  { %152 = vmatprep.subr.bf16.mxu0 %v271_v0  ;;  %s236_s24 = scalar_lea.vmem %s132_s23, 256  ;;  %p241_p11 = scmp.lt.s32.totalorder %s132_s23, %s132_s23 }
  0x3b   :  { %p237_p10 = scmp.ne.s32.totalorder %s132_s23, %s236_s24  ;;  %p242_p12 = scmp.lt.s32.totalorder %s236_s24, %s236_s24 }
  0x3d   :  { %153 = vmatpush3.bf16.msra.mxu0 %v169_v2  ;;  %p243_p13 = por %p242_p12, %p241_p11 }
  0x3f   :  { %p244_p0 = pnand %p243_p13, %p237_p10 }
  0x40   :  { %155 = vmatmul.mubr.msk.bf16.vlgmr.msra.gmra.mrb[0].mxu0 %vm78_vm1, %v59_v5 }
 0x113   :  { %v116_v7 = vpop.f32.mrb[0].mxu0 }
 0x114   :  { %v117_v9 = vadd.f32 %v116_v7, %v64_v6  ;;  %v156_v10 = vpop.f32.mrb[1].mxu0 }
 0x115   :  { %v119_v11 = vpop.f32.mrb[2].mxu0 }
 0x116   :  { %v120_v12 = vadd.f32 %v119_v11, %v65_v8  ;;  %v157_v13 = vpop.f32.mrb[3].mxu0  ;;  %124 = vst.msk [vmem:[#allocation8] sm:$0xff] %vm123_vm2, %v117_v9 }
 0x118   :  { %125 = vst.msk [vmem:[#allocation8 + $0x8] sm:$0xff] %vm123_vm2, %v120_v12 }
 0x119   :  { %247 = shalt.err (!%p244_p0)
}
 0x11a   :  { %s248_s27 = scalar_lea.hbm %s354_s3, 256 }
 0x11b   :  { %p249_p1 = scmp.ne.s32.totalorder %s354_s3, %s248_s27  ;;  %p252_p2 = scmp.lt.u32.totalorder %s248_s27, %s354_s3 }
 0x11d   :  { %p254_p3 = pnand %p252_p2, %p249_p1 }
 0x11f   :  { %257 = shalt.err (!%p254_p3)
}
 0x120   :  { %137 = dma.vmem_to_hbm [thread:$0]  %s132_s23, 256, %s354_s3, [#allocation4], %s268_s1, %s268_s1, %s269_s9  }
 0x121   :  { %262 = dma.done.wait [#allocation4], 256  }
 0x122   :  { %263 = vsyncadd [#allocation4], 4294967040 }
 0x123   :  { %141 = vsyncpa [#allocation3], 1 }
 0x124   :  { %142 = vsyncpa [#allocation6], 1 }
 0x125   :  { %143 = vsyncpa [#allocation4], 1 }

</bundles_post_ra>
